<compile_context>
chip_gen: v5e
topology: v5e:2x2
jax: 0.10.0
libtpu: 0.0.40
codegen_flags: <defaults>
</compile_context>

<pallas_src>
import jax
import jax.numpy as jnp
from jax import lax
from jax.experimental import pallas as pl
from jax.experimental.pallas import tpu as pltpu

H1, H2 = 64, 32
_NT = (((1,), (1,)), ((), ()))  # contract both minor dims: (m,k) x (n,k) -> (m,n)


def _mlp_kernel(x_ref, w1_ref, b1_ref, w2_ref, b2_ref, w3_ref, b3_ref, o_ref):
    # x tile arrives as f32 from HBM; the bf16 cast is a free VPU op in-kernel.
    xb = x_ref[...].astype(jnp.bfloat16)                                  # (TB, D)
    # Layer 1: W1 (64, D) x x^T (D, TB) -> (64, TB); bf16 MXU, f32 accumulation.
    h1 = lax.dot_general(w1_ref[...], xb, _NT,
                         preferred_element_type=jnp.float32)
    h1 = jnp.maximum(h1 + b1_ref[...], 0.0)                               # b1: (64, 1)
    # Layer 2: W2 (32, 64) x h1 (64, TB) -> (32, TB).
    h2 = jnp.dot(w2_ref[...], h1.astype(jnp.bfloat16),
                 preferred_element_type=jnp.float32)
    h2 = jnp.maximum(h2 + b2_ref[...], 0.0)                               # b2: (32, 1)
    # Layer 3 (out width 1): sublane multiply-reduce -> lane-dense (1, TB) row.
    out = jnp.sum(h2 * w3_ref[...], axis=0, keepdims=True) + b3_ref[0]    # w3: (32, 1)
    o_ref[...] = out.astype(o_ref.dtype)


def _round_up(x, m):
    return ((x + m - 1) // m) * m


def _vmem_budgets():
    """(x/temporaries tile budget, vmem_limit_bytes), generation aware."""
    cap = None
    try:
        cap = int(pltpu.get_tpu_info().vmem_capacity_bytes)
    except Exception:
        cap = None
    if cap is not None and cap > 96 * 1024 * 1024:      # v5e / v6e: 128 MiB physical
        return 40 * 1024 * 1024, 64 * 1024 * 1024
    return 20 * 1024 * 1024, 32 * 1024 * 1024           # v7x (64 MiB) or unknown: stay safe


def _normalize_tile(tile, batch):
    """Multiple of 8 rows, never larger than the padded batch, 128-aligned when
    the grid has more than one step (keeps the lane-dense output block legal)."""
    tile = max(8, (int(tile) + 7) // 8 * 8)
    tile = min(tile, _round_up(batch, 8))
    if pl.cdiv(batch, tile) > 1:
        tile = max(128, _round_up(tile, 128))
    return tile


def _pick_tile_b(batch, d, x_budget_bytes):
    row_x = _round_up(max(d, 1), 128) * 4            # f32 x row in VMEM (lanes pad to 128)
    row_tmp = 64 * (4 + 2) + 32 * (4 + 4) + 4        # h1 (f32+bf16) + h2/relu (f32) + out row
    tile = x_budget_bytes // (2 * row_x + row_tmp)   # x is double-buffered
    tile = min(max(int(tile), 8), 8192)
    # v7x has 2 TensorCores sharding the "parallel" axis: keep >=2 grid steps
    # once the batch is big enough to be worth splitting.
    if batch >= 256:
        tile = min(tile, _round_up(pl.cdiv(batch, 2), 128))
    return _normalize_tile(tile, batch)


def transaction_predictor(x, params, *, tile_b=None):
    """Fused 3-layer MLP forward.  x: (B, D) float32 -> (B, 1) float32."""
    B, D = x.shape
    x = x.astype(jnp.float32)                              # stays f32 into the kernel

    # Weights in PyTorch layout (out, in); HBM-heavy ones in bf16, biases f32.
    w1 = params["w1"].astype(jnp.bfloat16)                 # (64, D)
    b1 = params["b1"].reshape(H1, 1).astype(jnp.float32)   # (64, 1) broadcast over lanes
    w2 = params["w2"].astype(jnp.bfloat16)                 # (32, 64)
    b2 = params["b2"].reshape(H2, 1).astype(jnp.float32)   # (32, 1)
    w3 = params["w3"].reshape(H2, 1).astype(jnp.float32)   # (32, 1) column for the reduce
    b3 = params["b3"].reshape(1).astype(jnp.float32)       # (1,) scalar -> SMEM

    x_budget, vmem_limit = _vmem_budgets()
    tile_b = _pick_tile_b(B, D, x_budget) if tile_b is None else _normalize_tile(tile_b, B)

    n_tiles = pl.cdiv(B, tile_b)
    out_cols = n_tiles * tile_b

    # Full-array blocks with a constant index_map -> VMEM-resident across steps.
    def _resident(arr):
        return pl.BlockSpec(arr.shape, lambda i: (0,) * arr.ndim)

    flops = 2 * B * (D * H1 + H1 * H2 + H2)
    bytes_accessed = (
        B * D * 4 + out_cols * 4                          # x read (f32), out write (f32)
        + (w1.size + w2.size) * 2
        + (b1.size + b2.size + w3.size + b3.size) * 4
    )

    raw = pl.pallas_call(
        _mlp_kernel,
        out_shape=jax.ShapeDtypeStruct((1, out_cols), jnp.float32),
        grid=(n_tiles,),
        in_specs=[
            pl.BlockSpec((tile_b, D), lambda i: (i, 0)),          # x: tiled + double-buffered
            _resident(w1), _resident(b1),
            _resident(w2), _resident(b2),
            _resident(w3),
            pl.BlockSpec(memory_space=pltpu.MemorySpace.SMEM),    # b3 scalar
        ],
        out_specs=pl.BlockSpec((1, tile_b), lambda i: (0, i)),    # lane-dense output row
        compiler_params=pltpu.CompilerParams(
            dimension_semantics=("parallel",),    # both TensorCores on v7x; harmless elsewhere
            vmem_limit_bytes=vmem_limit,
        ),
        cost_estimate=pl.CostEstimate(
            flops=int(flops), transcendentals=0, bytes_accessed=int(bytes_accessed)),
    )(x, w1, b1, w2, b2, w3, b3)

    return raw[0, :B][:, None]


def init_params(input_dim, key):
    """Deterministic init mirroring nn.Linear (weights stored as (out, in))."""
    ks = jax.random.split(key, 6)

    def lin(kw, kb, fan_in, fan_out):
        bound = 1.0 / jnp.sqrt(fan_in)
        w = jax.random.uniform(kw, (fan_out, fan_in), jnp.float32, -bound, bound)
        b = jax.random.uniform(kb, (fan_out,), jnp.float32, -bound, bound)
        return w, b

    w1, b1 = lin(ks[0], ks[1], input_dim, H1)
    w2, b2 = lin(ks[2], ks[3], H1, H2)
    w3, b3 = lin(ks[4], ks[5], H2, 1)
    return {"w1": w1, "b1": b1, "w2": w2, "b2": b2, "w3": w3, "b3": b3}


def reference_forward_matched(x, p):
    """Pure-JAX reference with the kernel's bf16 operands / f32 accumulation."""
    xb = x.astype(jnp.bfloat16)
    w1 = p["w1"].astype(jnp.bfloat16)
    w2 = p["w2"].astype(jnp.bfloat16)
    h1 = lax.dot_general(xb, w1, _NT, preferred_element_type=jnp.float32) + p["b1"][None, :]
    h1 = jnp.maximum(h1, 0.0)
    h2 = lax.dot_general(h1.astype(jnp.bfloat16), w2, _NT,
                         preferred_element_type=jnp.float32) + p["b2"][None, :]
    h2 = jnp.maximum(h2, 0.0)
    return h2 @ p["w3"].T + p["b3"][None, :]


def reference_forward_f32(x, p):
    """Full-f32 math (PyTorch module semantics)."""
    h1 = jnp.maximum(x @ p["w1"].T + p["b1"], 0.0)
    h2 = jnp.maximum(h1 @ p["w2"].T + p["b2"], 0.0)
    return h2 @ p["w3"].T + p["b3"]


if __name__ == "__main__":
    key = jax.random.PRNGKey(0)
    k_x, k_p, k_x2 = jax.random.split(key, 3)

    batch, input_dim = 8, 16
    x = jax.random.normal(k_x, (batch, input_dim), jnp.float32)
    params = init_params(input_dim, k_p)

    out = jax.block_until_ready(transaction_predictor(x, params))
    ref = reference_forward_matched(x, params)
    assert out.shape == (batch, 1)
    assert jnp.allclose(out, ref, atol=2e-3, rtol=2e-3), float(jnp.max(jnp.abs(out - ref)))

    # Multi-tile grid with a ragged last block (no wrapper-side padding of x):
    # default tile (forced >= 2 grid steps) and an explicit 128-row tile.
    batch2 = 300
    x2 = jax.random.normal(k_x2, (batch2, input_dim), jnp.float32)
    out2 = jax.block_until_ready(transaction_predictor(x2, params))
    out2b = jax.block_until_ready(transaction_predictor(x2, params, tile_b=128))
    ref2 = reference_forward_matched(x2, params)
    assert out2.shape == (batch2, 1) and out2b.shape == (batch2, 1)
    assert jnp.allclose(out2, ref2, atol=2e-3, rtol=2e-3), float(jnp.max(jnp.abs(out2 - ref2)))
    assert jnp.allclose(out2b, ref2, atol=2e-3, rtol=2e-3), float(jnp.max(jnp.abs(out2b - ref2)))

    # Loose sanity check against full-f32 (bf16 operands introduce ~1e-3 level error).
    ref_f32 = reference_forward_f32(x, params)
    assert jnp.allclose(out, ref_f32, atol=5e-2, rtol=5e-2)

    print("KERNEL_OK")
</pallas_src>

<mosaic_0001>
module attributes {stable_mosaic.version = 11 : i64} {
  func.func @_mlp_kernel(%arg0: i32, %arg1: memref<8x16xf32, #tpu.memory_space<vmem>>, %arg2: memref<64x16xbf16, #tpu.memory_space<vmem>>, %arg3: memref<64x1xf32, #tpu.memory_space<vmem>>, %arg4: memref<32x64xbf16, #tpu.memory_space<vmem>>, %arg5: memref<32x1xf32, #tpu.memory_space<vmem>>, %arg6: memref<32x1xf32, #tpu.memory_space<vmem>>, %arg7: memref<1xf32, #tpu.memory_space<smem>>, %arg8: memref<1x8xf32, #tpu.memory_space<vmem>>) attributes {dimension_semantics = [#tpu.dimension_semantics<parallel>], iteration_bounds = array<i64: 1>, scalar_prefetch = 0 : i64, scratch_operands = 0 : i64, tpu.core_type = #tpu.core_type<tc>, window_params = [{transform_indices = @transform_0, window_bounds = array<i64: 8, 16>}, {pipeline_mode = #tpu.pipeline_mode<synchronous>, transform_indices = @transform_1, window_bounds = array<i64: 64, 16>}, {pipeline_mode = #tpu.pipeline_mode<synchronous>, transform_indices = @transform_2, window_bounds = array<i64: 64, 1>}, {pipeline_mode = #tpu.pipeline_mode<synchronous>, transform_indices = @transform_3, window_bounds = array<i64: 32, 64>}, {pipeline_mode = #tpu.pipeline_mode<synchronous>, transform_indices = @transform_4, window_bounds = array<i64: 32, 1>}, {pipeline_mode = #tpu.pipeline_mode<synchronous>, transform_indices = @transform_5, window_bounds = array<i64: 32, 1>}, {transform_indices = @transform_6, window_bounds = array<i64: 1>}, {transform_indices = @transform_7, window_bounds = array<i64: 1, 8>}]} {
    %c0 = arith.constant 0 : index
    %c0_0 = arith.constant 0 : index
    %0 = vector.load %arg1[%c0, %c0_0] : memref<8x16xf32, #tpu.memory_space<vmem>>, vector<8x16xf32>
    %1 = arith.truncf %0 : vector<8x16xf32> to vector<8x16xbf16>
    %c0_1 = arith.constant 0 : index
    %c0_2 = arith.constant 0 : index
    %2 = vector.load %arg2[%c0_1, %c0_2] : memref<64x16xbf16, #tpu.memory_space<vmem>>, vector<64x16xbf16>
    %cst = arith.constant dense<0.000000e+00> : vector<64x8xf32>
    %3 = tpu.matmul %2, %1, %cst {dimension_numbers = #tpu.dot_dimension_numbers<[1], [1], [0], [0], [0, 0, 1, 0], [], []>} : vector<64x16xbf16>, vector<8x16xbf16>, vector<64x8xf32> -> vector<64x8xf32>
    %c0_3 = arith.constant 0 : index
    %c0_4 = arith.constant 0 : index
    %4 = vector.load %arg3[%c0_3, %c0_4] : memref<64x1xf32, #tpu.memory_space<vmem>>, vector<64x1xf32>
    %5 = vector.broadcast %4 : vector<64x1xf32> to vector<64x8xf32>
    %6 = arith.addf %3, %5 : vector<64x8xf32>
    %cst_5 = arith.constant 0.000000e+00 : f32
    %7 = vector.broadcast %cst_5 : f32 to vector<64x8xf32>
    %8 = arith.maximumf %6, %7 : vector<64x8xf32>
    %c0_6 = arith.constant 0 : index
    %c0_7 = arith.constant 0 : index
    %9 = vector.load %arg4[%c0_6, %c0_7] : memref<32x64xbf16, #tpu.memory_space<vmem>>, vector<32x64xbf16>
    %10 = arith.truncf %8 : vector<64x8xf32> to vector<64x8xbf16>
    %cst_8 = arith.constant dense<0.000000e+00> : vector<32x8xf32>
    %11 = tpu.matmul %9, %10, %cst_8 {dimension_numbers = #tpu.dot_dimension_numbers<[1], [0], [0], [1], [0, 0, 1, 1], [], []>} : vector<32x64xbf16>, vector<64x8xbf16>, vector<32x8xf32> -> vector<32x8xf32>
    %c0_9 = arith.constant 0 : index
    %c0_10 = arith.constant 0 : index
    %12 = vector.load %arg5[%c0_9, %c0_10] : memref<32x1xf32, #tpu.memory_space<vmem>>, vector<32x1xf32>
    %13 = vector.broadcast %12 : vector<32x1xf32> to vector<32x8xf32>
    %14 = arith.addf %11, %13 : vector<32x8xf32>
    %cst_11 = arith.constant 0.000000e+00 : f32
    %15 = vector.broadcast %cst_11 : f32 to vector<32x8xf32>
    %16 = arith.maximumf %14, %15 : vector<32x8xf32>
    %c0_12 = arith.constant 0 : index
    %c0_13 = arith.constant 0 : index
    %17 = vector.load %arg6[%c0_12, %c0_13] : memref<32x1xf32, #tpu.memory_space<vmem>>, vector<32x1xf32>
    %18 = vector.broadcast %17 : vector<32x1xf32> to vector<32x8xf32>
    %19 = arith.mulf %16, %18 : vector<32x8xf32>
    %cst_14 = arith.constant dense<0.000000e+00> : vector<8xf32>
    %20 = vector.multi_reduction <add>, %19, %cst_14 [0] : vector<32x8xf32> to vector<8xf32>
    %21 = vector.shape_cast %20 : vector<8xf32> to vector<1x8xf32>
    %c0_15 = arith.constant 0 : index
    %22 = memref.load %arg7[%c0_15] : memref<1xf32, #tpu.memory_space<smem>>
    %23 = vector.broadcast %22 : f32 to vector<1x8xf32>
    %24 = arith.addf %21, %23 : vector<1x8xf32>
    %c0_16 = arith.constant 0 : index
    %c0_17 = arith.constant 0 : index
    %25 = vector.load %arg8[%c0_16, %c0_17] : memref<1x8xf32, #tpu.memory_space<vmem>>, vector<1x8xf32>
    tpu.vector_store %arg8[%c0_16, %c0_17], %24 {strides = array<i32>} : memref<1x8xf32, #tpu.memory_space<vmem>>, vector<1x8xf32>,
    return
  }
  func.func @transform_0(%arg0: i32) -> (i32, i32) {
    %c0_i32 = arith.constant 0 : i32
    %c0_i32_0 = arith.constant 0 : i32
    return %arg0, %c0_i32 : i32, i32
  }
  func.func @transform_1(%arg0: i32) -> (i32, i32) {
    %c0_i32 = arith.constant 0 : i32
    %c0_i32_0 = arith.constant 0 : i32
    %c0_i32_1 = arith.constant 0 : i32
    return %c0_i32, %c0_i32_0 : i32, i32
  }
  func.func @transform_2(%arg0: i32) -> (i32, i32) {
    %c0_i32 = arith.constant 0 : i32
    %c0_i32_0 = arith.constant 0 : i32
    %c0_i32_1 = arith.constant 0 : i32
    return %c0_i32, %c0_i32_0 : i32, i32
  }
  func.func @transform_3(%arg0: i32) -> (i32, i32) {
    %c0_i32 = arith.constant 0 : i32
    %c0_i32_0 = arith.constant 0 : i32
    %c0_i32_1 = arith.constant 0 : i32
    return %c0_i32, %c0_i32_0 : i32, i32
  }
  func.func @transform_4(%arg0: i32) -> (i32, i32) {
    %c0_i32 = arith.constant 0 : i32
    %c0_i32_0 = arith.constant 0 : i32
    %c0_i32_1 = arith.constant 0 : i32
    return %c0_i32, %c0_i32_0 : i32, i32
  }
  func.func @transform_5(%arg0: i32) -> (i32, i32) {
    %c0_i32 = arith.constant 0 : i32
    %c0_i32_0 = arith.constant 0 : i32
    %c0_i32_1 = arith.constant 0 : i32
    return %c0_i32, %c0_i32_0 : i32, i32
  }
  func.func @transform_6(%arg0: i32) -> i32 {
    %c0_i32 = arith.constant 0 : i32
    %c0_i32_0 = arith.constant 0 : i32
    return %c0_i32 : i32
  }
  func.func @transform_7(%arg0: i32) -> (i32, i32) {
    %c0_i32 = arith.constant 0 : i32
    %c0_i32_0 = arith.constant 0 : i32
    return %c0_i32, %arg0 : i32, i32
  }
}

</mosaic_0001>

<bundles_post_ra>
// kernel: tpu_custom_call.1
= control target key start
LH: loop header
LB: loop body
LE: loop exit
PB: predicated region body
PF: predicated region fallthrough
CT: control target
= control target key end

     0   :  { %vm107_vm0 = vcmask 130048   ;;  %v367_v2 = vmov 0   ;;  %s489_s0 = inlined_call_operand.vmem [shape: f32[8,16], index: 0, kind: input, shape index: {}]   ;;  %s490_s1 = inlined_call_operand.vmem [shape: bf16[64,16], index: 1, kind: input, shape index: {}]   ;;  %s491_s2 = inlined_call_operand.vmem [shape: f32[64,1], index: 2, kind: input, shape index: {}]   ;;  %s492_s3 = inlined_call_operand.vmem [shape: bf16[32,64], index: 3, kind: input, shape index: {}]   ;;  %s493_s4 = inlined_call_operand.vmem [shape: f32[32,1], index: 4, kind: input, shape index: {}]   ;;  %s494_s5 = inlined_call_operand.vmem [shape: f32[32,1], index: 5, kind: input, shape index: {}]   ;;  %s495_s6 = inlined_call_operand.<no memory space> [shape: f32[1], index: 6, kind: input, shape index: {}]   ;;  %s496_s7 = inlined_call_operand.hbm [shape: f32[1,8], index: 7, kind: output, shape index: {}]  }
   0x1   :  { %v45_v0 = vld [vmem:[%s491_s2 + $0x30] sm:$0xff]  ;;  %v29_v1 = vld [vmem:[%s489_s0] sm:$0xff]  ;;  %338 = vset.pattern.permute.xlu0 %v367_v2  ;;  %339 = vset.pattern.permute.xlu1 %v367_v2 }
   0x2   :  { %v30_v3 = vpack.c.bf16 %v29_v1, %v29_v1  ;;  %v43_v4 = vld [vmem:[%s491_s2 + $0x20] sm:$0xff]  ;;  %79 = vperm.xlu0 %338, %v45_v0   ;;  %340 = vset.pattern.permute.xlu2 %v367_v2  ;;  %v41_v6 = vld [vmem:[%s491_s2 + $0x10] sm:$0xff] }
   0x3   :  { %69 = vperm.xlu1 %339, %v43_v4   ;;  %59 = vperm.xlu2 %340, %v41_v6  }
   0x4   :  { %v121_v5 = vsel %vm107_vm0, %v30_v3, 0 }
   0x5   :  { %331 = vmatpush.bf16.xpose.msra.mxu2 %v121_v5  ;;  %130 = vmatpush.bf16.xpose.msra.mxu0 %v121_v5 }
   0x6   :  { %13 = vsyncpa [#allocation4], 0  ;;  %v327_v7 = vld [vmem:[%s490_s1 + $0x10] sm:$0xff]  ;;  %v46_v8 = vld [vmem:[%s491_s2 + $0x38] sm:$0xff]  ;;  %vm202_vm1 = vcmask 523264   ;;  %vm260_vm2 = vcmask 64512  }
   0x7   :  { %v325_v9 = vld [vmem:[%s490_s1] sm:$0xff]  ;;  %v44_v10 = vld [vmem:[%s491_s2 + $0x28] sm:$0xff]  ;;  %v42_v11 = vld [vmem:[%s491_s2 + $0x18] sm:$0xff]  ;;  %s368_s19 = smov [#allocation3]   ;;  %s286_s23 = sshll.u32 %s496_s7, 4  ;;  %vm277_vm3 = vcmask 57344   ;;  %s287_s23 = int_to_ptr.hbm [resolvable:$true] %s286_s23 }
   0x8   :  { %v39_v12 = vld [vmem:[%s491_s2] sm:$0xff]  ;;  %v40_v13 = vld [vmem:[%s491_s2 + $0x8] sm:$0xff]  ;;  %v328_v15 = vld [vmem:[%s490_s1 + $0x18] sm:$0xff]  ;;  %s284_s20 = sshll.u32 %s368_s19, 4  ;;  %s285_s20 = int_to_ptr.vmem [resolvable:$true] %s284_s20 }
   0x9   :  { %v168_v14 = vld [vmem:[%s493_s4] sm:$0xff]  ;;  %v169_v16 = vld [vmem:[%s493_s4 + $0x8] sm:$0xff]  ;;  %v170_v18 = vld [vmem:[%s493_s4 + $0x10] sm:$0xff] }
   0xa   :  { %84 = vperm.xlu0 %338, %v46_v8   ;;  %v326_v17 = vld [vmem:[%s490_s1 + $0x8] sm:$0xff]  ;;  %v171_v19 = vld [vmem:[%s493_s4 + $0x18] sm:$0xff]  ;;  %v232_v20 = vld [vmem:[%s494_s5] sm:$0xff] }
   0xb   :  { %74 = vperm.xlu1 %339, %v44_v10   ;;  %64 = vperm.xlu2 %340, %v42_v11   ;;  %v233_v21 = vld [vmem:[%s494_s5 + $0x8] sm:$0xff]  ;;  %v234_v22 = vld [vmem:[%s494_s5 + $0x10] sm:$0xff]  ;;  %v235_v23 = vld [vmem:[%s494_s5 + $0x18] sm:$0xff] }
   0xc   :  { %313 = vmatmul.msk.bf16.vlgmr.msra.gmra.mxu2 %vm107_vm0, %v327_v7  ;;  %311 = vmatmul.msk.bf16.vlgmr.msra.gmra.mxu0 %vm107_vm0, %v325_v9  ;;  %v329_v60 = vld [vmem:[%s492_s3] sm:$0xff]  ;;  %v330_v61 = vld [vmem:[%s492_s3 + $0x8] sm:$0xff] }
  0x12   :  { %49 = vperm.xlu0 %338, %v39_v12  }
  0x13   :  { %54 = vperm.xlu1 %339, %v40_v13   ;;  %174 = vperm.xlu2 %340, %v168_v14  }
  0x1a   :  { %179 = vperm.xlu0 %338, %v169_v16  }
  0x1b   :  { %184 = vperm.xlu1 %339, %v170_v18   ;;  %189 = vperm.xlu2 %340, %v171_v19  }
  0x1c   :  { %314 = vmatmul.msk.bf16.gmra.mxu2 %vm107_vm0, %v328_v15  ;;  %312 = vmatmul.msk.bf16.gmra.mxu0 %vm107_vm0, %v326_v17 }
  0x22   :  { %238 = vperm.xlu0 %338, %v232_v20  }
  0x23   :  { %243 = vperm.xlu1 %339, %v233_v21   ;;  %248 = vperm.xlu2 %340, %v234_v22  }
  0x2a   :  { %253 = vperm.xlu0 %338, %v235_v23  }
  0x5d   :  { %v60_v32 = vpop.permute.xlu2 %59 }
  0x65   :  { %v65_v43 = vpop.permute.xlu2 %64 }
  0x6d   :  { %v175_v62 = vpop.permute.xlu2 %174 }
  0x74   :  { %v80_v28 = vpop.permute.xlu0 %79 }
  0x75   :  { %v70_v29 = vpop.permute.xlu1 %69  ;;  %v190_v3 = vpop.permute.xlu2 %189 }
  0x7c   :  { %v85_v33 = vpop.permute.xlu0 %84 }
  0x7d   :  { %v75_v34 = vpop.permute.xlu1 %74  ;;  %v249_v15 = vpop.permute.xlu2 %248 }
  0x84   :  { %v50_v48 = vpop.permute.xlu0 %49 }
  0x85   :  { %v55_v51 = vpop.permute.xlu1 %54 }
  0x89   :  { %v132_v24 = vpop.f32.mrf.mxu0 }
  0x8a   :  { %v133_v50 = vadd.f32 %v132_v24, %v50_v48 }
  0x8c   :  { %v152_v56 = vmax.f32 %v133_v50, 0.0  ;;  %v180_v63 = vpop.permute.xlu0 %179 }
  0x8d   :  { %v185_v1 = vpop.permute.xlu1 %184 }
  0x8f   :  { %v142_v25 = vpop.f32.mrf.mxu2 }
  0x90   :  { %v143_v40 = vadd.f32 %v142_v25, %v70_v29 }
  0x91   :  { %v134_v26 = vpop.f32.mrf.mxu0 }
  0x92   :  { %v156_v49 = vmax.f32 %v143_v40, 0.0  ;;  %v135_v52 = vadd.f32 %v134_v26, %v55_v51 }
  0x94   :  { %v153_v57 = vmax.f32 %v135_v52, 0.0  ;;  %v239_v7 = vpop.permute.xlu0 %238 }
  0x95   :  { %v244_v13 = vpop.permute.xlu1 %243 }
  0x96   :  { %v164_v59 = vpack.c.bf16 %v153_v57, %v152_v56 }
  0x97   :  { %v144_v27 = vpop.f32.mrf.mxu2 }
  0x98   :  { %v145_v37 = vadd.f32 %v144_v27, %v75_v34  ;;  %v275_v34 = vstv %s495_s6 }
  0x99   :  { %v137_v30 = vpop.f32.mrf.mxu0 }
  0x9a   :  { %v157_v44 = vmax.f32 %v145_v37, 0.0  ;;  %v138_v45 = vadd.f32 %v137_v30, %v60_v32 }
  0x9c   :  { %v154_v53 = vmax.f32 %v138_v45, 0.0  ;;  %v166_v55 = vpack.c.bf16 %v157_v44, %v156_v49  ;;  %v254_v23 = vpop.permute.xlu0 %253 }
  0x9f   :  { %v147_v31 = vpop.f32.mrf.mxu2 }
  0xa0   :  { %v148_v35 = vadd.f32 %v147_v31, %v80_v28 }
  0xa1   :  { %v139_v39 = vpop.f32.mrf.mxu0 }
  0xa2   :  { %v158_v41 = vmax.f32 %v148_v35, 0.0  ;;  %v140_v46 = vadd.f32 %v139_v39, %v65_v43 }
  0xa4   :  { %v155_v54 = vmax.f32 %v140_v46, 0.0 }
  0xa6   :  { %v165_v58 = vpack.c.bf16 %v155_v54, %v154_v53 }
  0xa7   :  { %v149_v36 = vpop.f32.mrf.mxu2 }
  0xa8   :  { %v150_v38 = vadd.f32 %v149_v36, %v85_v33 }
  0xaa   :  { %v159_v42 = vmax.f32 %v150_v38, 0.0 }
  0xac   :  { %v167_v47 = vpack.c.bf16 %v159_v42, %v158_v41 }
  0xae   :  { %213 = vmatpush.bf16.msra.mxu1 %v167_v47  ;;  %332 = vmatpush.bf16.msra.mxu3 %v167_v47 }
  0xb2   :  { %214 = vmatpush.bf16.msra.mxu1 %v166_v55  ;;  %333 = vmatpush.bf16.msra.mxu3 %v166_v55 }
  0xb6   :  { %215 = vmatpush.bf16.msra.mxu1 %v165_v58  ;;  %334 = vmatpush.bf16.msra.mxu3 %v165_v58 }
  0xba   :  { %216 = vmatpush.bf16.msra.mxu1 %v164_v59  ;;  %335 = vmatpush.bf16.msra.mxu3 %v164_v59 }
  0xbd   :  { %323 = vmatmul.msk.bf16.vlgmr.msra.gmra.mxu1 %vm202_vm1, %v329_v60  ;;  %324 = vmatmul.msk.bf16.vlgmr.msra.gmra.mxu3 %vm202_vm1, %v330_v61 }
 0x13a   :  { %v218_v0 = vpop.f32.mrf.mxu1 }
 0x13b   :  { %v219_v2 = vadd.f32 %v218_v0, %v175_v62 }
 0x13d   :  { %v228_v5 = vmax.f32 %v219_v2, 0.0 }
 0x13f   :  { %v256_v10 = vmul.f32 %v239_v7, %v228_v5 }
 0x140   :  { %v223_v4 = vpop.f32.mrf.mxu3 }
 0x141   :  { %v224_v6 = vadd.f32 %v223_v4, %v185_v1  ;;  %v261_v17 = vsel %vm260_vm2, %v256_v10, 0.0 }
 0x142   :  { %v220_v8 = vpop.f32.mrf.mxu1 }
 0x143   :  { %v221_v9 = vadd.f32 %v220_v8, %v180_v63  ;;  %v230_v11 = vmax.f32 %v224_v6, 0.0 }
 0x145   :  { %v229_v12 = vmax.f32 %v221_v9, 0.0  ;;  %v258_v18 = vmul.f32 %v249_v15, %v230_v11 }
 0x147   :  { %v257_v14 = vmul.f32 %v244_v13, %v229_v12  ;;  %v264_v24 = vsel %vm260_vm2, %v258_v18, 0.0 }
 0x148   :  { %v225_v16 = vpop.f32.mrf.mxu3 }
 0x149   :  { %v262_v19 = vsel %vm260_vm2, %v257_v14, 0.0  ;;  %v226_v20 = vadd.f32 %v225_v16, %v190_v3 }
 0x14a   :  { %v263_v21 = vadd.f32 %v262_v19, %v261_v17 }
 0x14b   :  { %v231_v22 = vmax.f32 %v226_v20, 0.0 }
 0x14c   :  { %v265_v26 = vadd.f32 %v264_v24, %v263_v21 }
 0x14d   :  { %v259_v25 = vmul.f32 %v254_v23, %v231_v22 }
 0x14f   :  { %v266_v27 = vsel %vm260_vm2, %v259_v25, 0.0 }
 0x150   :  { %v267_v28 = vadd.f32 %v266_v27, %v265_v26 }
 0x152   :  { %v268_v29 = vrot.slane %v267_v28, 4 }
 0x154   :  { %v269_v30 = vadd.f32 %v268_v29, %v267_v28 }
 0x156   :  { %v270_v31 = vrot.slane %v269_v30, 2 }
 0x158   :  { %v271_v32 = vadd.f32 %v270_v31, %v269_v30 }
 0x15a   :  { %v272_v33 = vrot.slane %v271_v32, 1 }
 0x15c   :  { %v273_v35 = vadd.f32 %v272_v33, %v271_v32 }
 0x15e   :  { %v276_v36 = vadd.f32 %v275_v34, %v273_v35 }
 0x160   :  { %278 = vst.msk [vmem:[#allocation3] sm:$0x1] %vm277_vm3, %v276_v36 }
 0x161   :  { %289 = dma.vmem_to_hbm [thread:$0]  %s285_s20, 16, %s287_s23, [#allocation4]  }
 0x162   :  { %365 = dma.done.wait [#allocation4], 16  }
 0x163   :  { %366 = vsyncadd [#allocation4], 4294967280 }
 0x164   :  { %294 = vsyncpa [#allocation4], 1 }

</bundles_post_ra>
